<compile_context>
chip_gen: v5e
topology: v5e:2x2
jax: 0.10.0
libtpu: 0.0.40
codegen_flags: <defaults>
</compile_context>

<pallas_src>
import functools

import jax
import jax.numpy as jnp
from jax.experimental import pallas as pl
from jax.experimental.pallas import tpu as pltpu


def _round_up(x, m):
    return (x + m - 1) // m * m


def dueling_mlp_kernel(x_ref,
                       w1_ref, b1_ref,
                       w2_ref, b2_ref,
                       wav1_ref, bav1_ref,
                       wav2_ref, bav2_ref,
                       out_ref):
    x = x_ref[...]                                                  # (TB, IN_PAD) bf16

    # trunk: fc1 -> relu -> fc2 -> relu   (bf16 MXU, f32 accumulate)
    h = jnp.dot(x, w1_ref[...], preferred_element_type=jnp.float32) + b1_ref[...]
    h = jnp.maximum(h, 0.0).astype(jnp.bfloat16)
    h = jnp.dot(h, w2_ref[...], preferred_element_type=jnp.float32) + b2_ref[...]
    h = jnp.maximum(h, 0.0).astype(jnp.bfloat16)

    # fused adv|val hidden layer: lanes [0,H)=adv branch, [H,2H)=val branch
    av = jnp.dot(h, wav1_ref[...], preferred_element_type=jnp.float32) + bav1_ref[...]
    av = jnp.maximum(av, 0.0).astype(jnp.bfloat16)

    # block-diagonal second stage: y[:, :A] = adv, y[:, A] = val, rest = 0
    y = jnp.dot(av, wav2_ref[...], preferred_element_type=jnp.float32) + bav2_ref[...]

    # Lane-dense bf16 store (unmasked vst: TB is a multiple of 16, lanes = 128*k).
    out_ref[...] = y.astype(out_ref.dtype)


def init_params(key, input_size, num_actions, num_hidden):
    """nn.Linear-style init (uniform +-1/sqrt(fan_in)); weights stored transposed
    as (in_features, out_features), biases as (1, out_features).  Weights are
    rounded through bf16 so the bf16 kernel and the f32 reference share
    identical parameter values."""
    in_flat = input_size[0] * input_size[1]

    def linear(k, fan_in, fan_out):
        kw, kb = jax.random.split(k)
        bound = 1.0 / float(fan_in) ** 0.5
        w = jax.random.uniform(kw, (fan_in, fan_out), jnp.float32, -bound, bound)
        w = w.astype(jnp.bfloat16).astype(jnp.float32)
        b = jax.random.uniform(kb, (1, fan_out), jnp.float32, -bound, bound)
        return w, b

    keys = jax.random.split(key, 6)
    w1, b1 = linear(keys[0], in_flat, num_hidden)
    w2, b2 = linear(keys[1], num_hidden, num_hidden)
    wa1, ba1 = linear(keys[2], num_hidden, num_hidden)
    wa2, ba2 = linear(keys[3], num_hidden, num_actions)
    wv1, bv1 = linear(keys[4], num_hidden, num_hidden)
    wv2, bv2 = linear(keys[5], num_hidden, 1)
    return dict(w1=w1, b1=b1, w2=w2, b2=b2,
                wa1=wa1, ba1=ba1, wa2=wa2, ba2=ba2,
                wv1=wv1, bv1=bv1, wv2=wv2, bv2=bv2)


def pack_params(params):
    """Pad to lane-dense shapes, pack adv/val branches into a single
    lane-aligned block, cast weights to bf16 (biases stay f32)."""
    w1, b1 = params["w1"], params["b1"]
    w2, b2 = params["w2"], params["b2"]
    wa1, ba1 = params["wa1"], params["ba1"]
    wa2, ba2 = params["wa2"], params["ba2"]
    wv1, bv1 = params["wv1"], params["bv1"]
    wv2, bv2 = params["wv2"], params["bv2"]

    in_flat, H = w1.shape
    A = wa2.shape[1]
    in_pad = _round_up(in_flat, 128)
    h_pad = _round_up(H, 128)
    av_pad = _round_up(2 * H, 128)           # adv hidden [0,H) | val hidden [H,2H)
    out_pad = _round_up(A + 1, 128)          # A adv lanes + 1 val lane

    f32 = jnp.float32
    bf16 = jnp.bfloat16

    def pad2(a, rows, cols):
        return jnp.pad(a, ((0, rows - a.shape[0]), (0, cols - a.shape[1])))

    w1p = pad2(w1, in_pad, h_pad)
    b1p = pad2(b1, 1, h_pad)
    w2p = pad2(w2, h_pad, h_pad)
    b2p = pad2(b2, 1, h_pad)

    # fused adv|val first stage: (h_pad, av_pad), contiguous branch packing
    wav1 = jnp.zeros((h_pad, av_pad), f32)
    wav1 = wav1.at[:H, :H].set(wa1).at[:H, H:2 * H].set(wv1)
    bav1 = jnp.zeros((1, av_pad), f32)
    bav1 = bav1.at[:, :H].set(ba1).at[:, H:2 * H].set(bv1)

    # block-diagonal second stage: rows [0,H) -> adv lanes [0,A); rows [H,2H) -> val lane A
    wav2 = jnp.zeros((av_pad, out_pad), f32)
    wav2 = wav2.at[:H, :A].set(wa2).at[H:2 * H, A:A + 1].set(wv2)
    bav2 = jnp.zeros((1, out_pad), f32)
    bav2 = bav2.at[:, :A].set(ba2).at[:, A:A + 1].set(bv2)

    packed = dict(
        w1=w1p.astype(bf16), b1=b1p,
        w2=w2p.astype(bf16), b2=b2p,
        wav1=wav1.astype(bf16), bav1=bav1,
        wav2=wav2.astype(bf16), bav2=bav2,
    )
    dims = dict(in_flat=in_flat, in_pad=in_pad, h_pad=h_pad,
                av_pad=av_pad, num_actions=A, out_pad=out_pad)
    return packed, dims


def _pick_tile_rows(B, dims):
    """Big tiles amortize the ~0.35us per-grid-step overhead and reach the HBM
    roofline; cap them with a rough per-row VMEM estimate (f32 intermediates +
    bf16 copies + double-buffered x/out streams) so v5e's 16 MiB scoped-VMEM
    default is never approached."""
    in_pad, h_pad = dims["in_pad"], dims["h_pad"]
    av_pad, out_pad = dims["av_pad"], dims["out_pad"]
    bytes_per_row = (4 * (2 * h_pad + av_pad + out_pad)          # f32 intermediates
                     + 2 * (in_pad + 2 * h_pad + av_pad + out_pad)   # bf16 copies
                     + 2 * 2 * (in_pad + out_pad))               # double-buffered io
    budget = 8 << 20
    max_tile = max(256, min(4096, (budget // bytes_per_row) // 16 * 16))

    if B <= max_tile:
        # Single tile: small-batch / latency path (splitting a tiny batch across
        # v7x's two TensorCores just adds a grid step for a us-scale kernel).
        return _round_up(max(B, 16), 16)
    n = pl.cdiv(B, max_tile)
    if n % 2:
        n += 1                 # even tile count -> both v7x TensorCores stay busy
    return _round_up(pl.cdiv(B, n), 16)


def dueling_mlp_forward(x, packed, dims, *, tile_rows=None):
    """x: (B, H, W).  Returns (B, num_actions) = val + adv - adv.mean()."""
    A = dims["num_actions"]
    in_flat, in_pad = dims["in_flat"], dims["in_pad"]
    out_pad = dims["out_pad"]

    B = x.shape[0]
    x2 = x.reshape(B, -1)
    assert x2.shape[1] == in_flat

    if tile_rows is None:
        tile_rows = _pick_tile_rows(B, dims)
    tile_rows = _round_up(max(tile_rows, 16), 16)   # 16 = bf16 sublane pack -> unmasked ld/st
    b_pad = _round_up(max(B, tile_rows), tile_rows)
    num_tiles = b_pad // tile_rows

    # Cast to bf16 BEFORE padding (half the pad-op bytes, no f32 round trip).
    # TODO(synk): stretch goal — pass x unpadded with a (tile_rows, in_flat) block
    # (K=64 matmul) to halve the input stream; keep the safe 128-lane pad for now.
    x_pad = jnp.pad(x2.astype(jnp.bfloat16),
                    ((0, b_pad - B), (0, in_pad - in_flat)))

    w1, b1 = packed["w1"], packed["b1"]
    w2, b2 = packed["w2"], packed["b2"]
    wav1, bav1 = packed["wav1"], packed["bav1"]
    wav2, bav2 = packed["wav2"], packed["bav2"]

    def resident(a):   # full array, constant block index -> stays resident in VMEM
        return pl.BlockSpec(a.shape, lambda i: (0, 0))

    h_pad, av_pad = dims["h_pad"], dims["av_pad"]
    flops = 2 * b_pad * (in_pad * h_pad + h_pad * h_pad
                         + h_pad * av_pad + av_pad * out_pad)
    param_bytes = sum(int(a.size) * a.dtype.itemsize
                      for a in (w1, b1, w2, b2, wav1, bav1, wav2, bav2))
    bytes_accessed = int(x_pad.size) * 2 + param_bytes + b_pad * out_pad * 2

    y = pl.pallas_call(
        dueling_mlp_kernel,
        out_shape=jax.ShapeDtypeStruct((b_pad, out_pad), jnp.bfloat16),
        grid_spec=pltpu.PrefetchScalarGridSpec(
            num_scalar_prefetch=0,
            grid=(num_tiles,),
            in_specs=[
                pl.BlockSpec((tile_rows, in_pad), lambda i: (i, 0)),
                resident(w1), resident(b1),
                resident(w2), resident(b2),
                resident(wav1), resident(bav1),
                resident(wav2), resident(bav2),
            ],
            out_specs=pl.BlockSpec((tile_rows, out_pad), lambda i: (i, 0)),
        ),
        compiler_params=pltpu.CompilerParams(
            dimension_semantics=("parallel",)),
        cost_estimate=pl.CostEstimate(
            flops=flops, transcendentals=0, bytes_accessed=bytes_accessed),
    )(x_pad, w1, b1, w2, b2, wav1, bav1, wav2, bav2)

    # Tiny epilogue on real rows only (fused under the caller's jit):
    # torch's adv.mean() is a global mean over (B, A), which couples all batch
    # rows, so it is finalized here rather than inside the batch-tiled kernel.
    adv = y[:B, :A].astype(jnp.float32)
    val = y[:B, A:A + 1].astype(jnp.float32)
    return val + adv - jnp.mean(adv)


def reference_forward(x, params):
    """Pure-JAX f32 reference mirroring the PyTorch forward."""
    h = x.reshape(x.shape[0], -1)
    h = jax.nn.relu(h @ params["w1"] + params["b1"])
    h = jax.nn.relu(h @ params["w2"] + params["b2"])
    adv = jax.nn.relu(h @ params["wa1"] + params["ba1"]) @ params["wa2"] + params["ba2"]
    val = jax.nn.relu(h @ params["wv1"] + params["bv1"]) @ params["wv2"] + params["bv2"]
    return val + adv - adv.mean()


if __name__ == "__main__":
    # Small shapes consistent with the module: input_size=(8, 8), hidden=32, actions=4
    input_size = (8, 8)
    num_actions = 4
    num_hidden = 32

    key = jax.random.PRNGKey(0)
    k_params, k_x1, k_x2 = jax.random.split(key, 3)
    params = init_params(k_params, input_size, num_actions, num_hidden)
    packed, dims = pack_params(params)

    # Whole forward (reshape/cast/pad + pallas_call + epilogue) under one jit.
    fwd = jax.jit(functools.partial(dueling_mlp_forward, packed=packed, dims=dims))

    # batch=2 (padded to one 16-row bf16 tile internally)
    x = jax.random.normal(k_x1, (2, *input_size), jnp.float32)
    x = x.astype(jnp.bfloat16).astype(jnp.float32)   # make the kernel's bf16 cast lossless
    out = jax.block_until_ready(fwd(x))
    ref = reference_forward(x, params)
    assert out.shape == (2, num_actions)
    assert jnp.allclose(out, ref, atol=3e-2, rtol=3e-2), "mismatch vs reference (B=2)"

    # larger batch exercising the multi-tile grid and VMEM-resident weights
    fwd_mt = jax.jit(functools.partial(dueling_mlp_forward, packed=packed, dims=dims,
                                       tile_rows=16))
    x2 = jax.random.normal(k_x2, (40, *input_size), jnp.float32)
    x2 = x2.astype(jnp.bfloat16).astype(jnp.float32)
    out2 = jax.block_until_ready(fwd_mt(x2))
    ref2 = reference_forward(x2, params)
    assert out2.shape == (40, num_actions)
    assert jnp.allclose(out2, ref2, atol=3e-2, rtol=3e-2), "mismatch vs reference (B=40)"

    print("KERNEL_OK")
</pallas_src>

<mosaic_0001>
module attributes {stable_mosaic.version = 11 : i64} {
  func.func @dueling_mlp_kernel(%arg0: i32, %arg1: memref<16x128xbf16, #tpu.memory_space<vmem>>, %arg2: memref<128x128xbf16, #tpu.memory_space<vmem>>, %arg3: memref<1x128xf32, #tpu.memory_space<vmem>>, %arg4: memref<128x128xbf16, #tpu.memory_space<vmem>>, %arg5: memref<1x128xf32, #tpu.memory_space<vmem>>, %arg6: memref<128x128xbf16, #tpu.memory_space<vmem>>, %arg7: memref<1x128xf32, #tpu.memory_space<vmem>>, %arg8: memref<128x128xbf16, #tpu.memory_space<vmem>>, %arg9: memref<1x128xf32, #tpu.memory_space<vmem>>, %arg10: memref<16x128xbf16, #tpu.memory_space<vmem>>) attributes {dimension_semantics = [#tpu.dimension_semantics<parallel>], iteration_bounds = array<i64: 1>, scalar_prefetch = 0 : i64, scratch_operands = 0 : i64, tpu.core_type = #tpu.core_type<tc>, window_params = [{transform_indices = @transform_0, window_bounds = array<i64: 16, 128>}, {pipeline_mode = #tpu.pipeline_mode<synchronous>, transform_indices = @transform_1, window_bounds = array<i64: 128, 128>}, {pipeline_mode = #tpu.pipeline_mode<synchronous>, transform_indices = @transform_2, window_bounds = array<i64: 1, 128>}, {pipeline_mode = #tpu.pipeline_mode<synchronous>, transform_indices = @transform_3, window_bounds = array<i64: 128, 128>}, {pipeline_mode = #tpu.pipeline_mode<synchronous>, transform_indices = @transform_4, window_bounds = array<i64: 1, 128>}, {pipeline_mode = #tpu.pipeline_mode<synchronous>, transform_indices = @transform_5, window_bounds = array<i64: 128, 128>}, {pipeline_mode = #tpu.pipeline_mode<synchronous>, transform_indices = @transform_6, window_bounds = array<i64: 1, 128>}, {pipeline_mode = #tpu.pipeline_mode<synchronous>, transform_indices = @transform_7, window_bounds = array<i64: 128, 128>}, {pipeline_mode = #tpu.pipeline_mode<synchronous>, transform_indices = @transform_8, window_bounds = array<i64: 1, 128>}, {transform_indices = @transform_9, window_bounds = array<i64: 16, 128>}]} {
    %c0 = arith.constant 0 : index
    %c0_0 = arith.constant 0 : index
    %0 = vector.load %arg1[%c0, %c0_0] : memref<16x128xbf16, #tpu.memory_space<vmem>>, vector<16x128xbf16>
    %c0_1 = arith.constant 0 : index
    %c0_2 = arith.constant 0 : index
    %1 = vector.load %arg2[%c0_1, %c0_2] : memref<128x128xbf16, #tpu.memory_space<vmem>>, vector<128x128xbf16>
    %cst = arith.constant dense<0.000000e+00> : vector<16x128xf32>
    %2 = tpu.matmul %0, %1, %cst {dimension_numbers = #tpu.dot_dimension_numbers<[1], [0], [0], [1], [0, 0, 1, 1], [], []>} : vector<16x128xbf16>, vector<128x128xbf16>, vector<16x128xf32> -> vector<16x128xf32>
    %c0_3 = arith.constant 0 : index
    %c0_4 = arith.constant 0 : index
    %3 = vector.load %arg3[%c0_3, %c0_4] : memref<1x128xf32, #tpu.memory_space<vmem>>, vector<1x128xf32>
    %4 = vector.broadcast %3 : vector<1x128xf32> to vector<16x128xf32>
    %5 = arith.addf %2, %4 : vector<16x128xf32>
    %cst_5 = arith.constant 0.000000e+00 : f32
    %6 = vector.broadcast %cst_5 : f32 to vector<16x128xf32>
    %7 = arith.maximumf %5, %6 : vector<16x128xf32>
    %8 = arith.truncf %7 : vector<16x128xf32> to vector<16x128xbf16>
    %c0_6 = arith.constant 0 : index
    %c0_7 = arith.constant 0 : index
    %9 = vector.load %arg4[%c0_6, %c0_7] : memref<128x128xbf16, #tpu.memory_space<vmem>>, vector<128x128xbf16>
    %cst_8 = arith.constant dense<0.000000e+00> : vector<16x128xf32>
    %10 = tpu.matmul %8, %9, %cst_8 {dimension_numbers = #tpu.dot_dimension_numbers<[1], [0], [0], [1], [0, 0, 1, 1], [], []>} : vector<16x128xbf16>, vector<128x128xbf16>, vector<16x128xf32> -> vector<16x128xf32>
    %c0_9 = arith.constant 0 : index
    %c0_10 = arith.constant 0 : index
    %11 = vector.load %arg5[%c0_9, %c0_10] : memref<1x128xf32, #tpu.memory_space<vmem>>, vector<1x128xf32>
    %12 = vector.broadcast %11 : vector<1x128xf32> to vector<16x128xf32>
    %13 = arith.addf %10, %12 : vector<16x128xf32>
    %cst_11 = arith.constant 0.000000e+00 : f32
    %14 = vector.broadcast %cst_11 : f32 to vector<16x128xf32>
    %15 = arith.maximumf %13, %14 : vector<16x128xf32>
    %16 = arith.truncf %15 : vector<16x128xf32> to vector<16x128xbf16>
    %c0_12 = arith.constant 0 : index
    %c0_13 = arith.constant 0 : index
    %17 = vector.load %arg6[%c0_12, %c0_13] : memref<128x128xbf16, #tpu.memory_space<vmem>>, vector<128x128xbf16>
    %cst_14 = arith.constant dense<0.000000e+00> : vector<16x128xf32>
    %18 = tpu.matmul %16, %17, %cst_14 {dimension_numbers = #tpu.dot_dimension_numbers<[1], [0], [0], [1], [0, 0, 1, 1], [], []>} : vector<16x128xbf16>, vector<128x128xbf16>, vector<16x128xf32> -> vector<16x128xf32>
    %c0_15 = arith.constant 0 : index
    %c0_16 = arith.constant 0 : index
    %19 = vector.load %arg7[%c0_15, %c0_16] : memref<1x128xf32, #tpu.memory_space<vmem>>, vector<1x128xf32>
    %20 = vector.broadcast %19 : vector<1x128xf32> to vector<16x128xf32>
    %21 = arith.addf %18, %20 : vector<16x128xf32>
    %cst_17 = arith.constant 0.000000e+00 : f32
    %22 = vector.broadcast %cst_17 : f32 to vector<16x128xf32>
    %23 = arith.maximumf %21, %22 : vector<16x128xf32>
    %24 = arith.truncf %23 : vector<16x128xf32> to vector<16x128xbf16>
    %c0_18 = arith.constant 0 : index
    %c0_19 = arith.constant 0 : index
    %25 = vector.load %arg8[%c0_18, %c0_19] : memref<128x128xbf16, #tpu.memory_space<vmem>>, vector<128x128xbf16>
    %cst_20 = arith.constant dense<0.000000e+00> : vector<16x128xf32>
    %26 = tpu.matmul %24, %25, %cst_20 {dimension_numbers = #tpu.dot_dimension_numbers<[1], [0], [0], [1], [0, 0, 1, 1], [], []>} : vector<16x128xbf16>, vector<128x128xbf16>, vector<16x128xf32> -> vector<16x128xf32>
    %c0_21 = arith.constant 0 : index
    %c0_22 = arith.constant 0 : index
    %27 = vector.load %arg9[%c0_21, %c0_22] : memref<1x128xf32, #tpu.memory_space<vmem>>, vector<1x128xf32>
    %28 = vector.broadcast %27 : vector<1x128xf32> to vector<16x128xf32>
    %29 = arith.addf %26, %28 : vector<16x128xf32>
    %30 = arith.truncf %29 : vector<16x128xf32> to vector<16x128xbf16>
    %c0_23 = arith.constant 0 : index
    %c0_24 = arith.constant 0 : index
    %31 = vector.load %arg10[%c0_23, %c0_24] : memref<16x128xbf16, #tpu.memory_space<vmem>>, vector<16x128xbf16>
    tpu.vector_store %arg10[%c0_23, %c0_24], %30 {strides = array<i32>} : memref<16x128xbf16, #tpu.memory_space<vmem>>, vector<16x128xbf16>,
    return
  }
  func.func @transform_0(%arg0: i32) -> (i32, i32) {
    %c0_i32 = arith.constant 0 : i32
    %c0_i32_0 = arith.constant 0 : i32
    return %arg0, %c0_i32 : i32, i32
  }
  func.func @transform_1(%arg0: i32) -> (i32, i32) {
    %c0_i32 = arith.constant 0 : i32
    %c0_i32_0 = arith.constant 0 : i32
    %c0_i32_1 = arith.constant 0 : i32
    return %c0_i32, %c0_i32_0 : i32, i32
  }
  func.func @transform_2(%arg0: i32) -> (i32, i32) {
    %c0_i32 = arith.constant 0 : i32
    %c0_i32_0 = arith.constant 0 : i32
    %c0_i32_1 = arith.constant 0 : i32
    return %c0_i32, %c0_i32_0 : i32, i32
  }
  func.func @transform_3(%arg0: i32) -> (i32, i32) {
    %c0_i32 = arith.constant 0 : i32
    %c0_i32_0 = arith.constant 0 : i32
    %c0_i32_1 = arith.constant 0 : i32
    return %c0_i32, %c0_i32_0 : i32, i32
  }
  func.func @transform_4(%arg0: i32) -> (i32, i32) {
    %c0_i32 = arith.constant 0 : i32
    %c0_i32_0 = arith.constant 0 : i32
    %c0_i32_1 = arith.constant 0 : i32
    return %c0_i32, %c0_i32_0 : i32, i32
  }
  func.func @transform_5(%arg0: i32) -> (i32, i32) {
    %c0_i32 = arith.constant 0 : i32
    %c0_i32_0 = arith.constant 0 : i32
    %c0_i32_1 = arith.constant 0 : i32
    return %c0_i32, %c0_i32_0 : i32, i32
  }
  func.func @transform_6(%arg0: i32) -> (i32, i32) {
    %c0_i32 = arith.constant 0 : i32
    %c0_i32_0 = arith.constant 0 : i32
    %c0_i32_1 = arith.constant 0 : i32
    return %c0_i32, %c0_i32_0 : i32, i32
  }
  func.func @transform_7(%arg0: i32) -> (i32, i32) {
    %c0_i32 = arith.constant 0 : i32
    %c0_i32_0 = arith.constant 0 : i32
    %c0_i32_1 = arith.constant 0 : i32
    return %c0_i32, %c0_i32_0 : i32, i32
  }
  func.func @transform_8(%arg0: i32) -> (i32, i32) {
    %c0_i32 = arith.constant 0 : i32
    %c0_i32_0 = arith.constant 0 : i32
    %c0_i32_1 = arith.constant 0 : i32
    return %c0_i32, %c0_i32_0 : i32, i32
  }
  func.func @transform_9(%arg0: i32) -> (i32, i32) {
    %c0_i32 = arith.constant 0 : i32
    %c0_i32_0 = arith.constant 0 : i32
    return %arg0, %c0_i32 : i32, i32
  }
}

</mosaic_0001>

<bundles_post_ra>
// kernel: dueling_mlp_forward.1
= control target key start
LH: loop header
LB: loop body
LE: loop exit
PB: predicated region body
PF: predicated region fallthrough
CT: control target
= control target key end

     0   :  { %14 = vsyncpa [#allocation3], 0  ;;  %s819_s0 = inlined_call_operand.vmem [shape: bf16[16,128], index: 0, kind: input, shape index: {}]   ;;  %s820_s1 = inlined_call_operand.hbm [shape: bf16[128,128], index: 1, kind: input, shape index: {}]   ;;  %s821_s2 = inlined_call_operand.vmem [shape: f32[1,128], index: 2, kind: input, shape index: {}]   ;;  %s822_s3 = inlined_call_operand.hbm [shape: bf16[128,128], index: 3, kind: input, shape index: {}]   ;;  %s823_s4 = inlined_call_operand.vmem [shape: f32[1,128], index: 4, kind: input, shape index: {}]   ;;  %s824_s5 = inlined_call_operand.hbm [shape: bf16[128,128], index: 5, kind: input, shape index: {}]   ;;  %s825_s6 = inlined_call_operand.vmem [shape: f32[1,128], index: 6, kind: input, shape index: {}]   ;;  %s826_s7 = inlined_call_operand.hbm [shape: bf16[128,128], index: 7, kind: input, shape index: {}]   ;;  %s827_s8 = inlined_call_operand.vmem [shape: f32[1,128], index: 8, kind: input, shape index: {}]   ;;  %s828_s9 = inlined_call_operand.vmem [shape: bf16[16,128], index: 9, kind: output, shape index: {}]  }
   0x1   :  { %15 = vsyncpa [#allocation5], 0 }
   0x2   :  { %16 = vsyncpa [#allocation8], 0  ;;  %s38_s11 = sshll.u32 %s822_s3, 4  ;;  %s733_s12 = smov [#allocation4]   ;;  %s39_s11 = int_to_ptr.hbm [resolvable:$true] %s38_s11 }
   0x3   :  { %s40_s13 = sshll.u32 %s733_s12, 4  ;;  %s23_s16 = sshll.u32 %s820_s1, 4  ;;  %s41_s13 = int_to_ptr.vmem [resolvable:$true] %s40_s13  ;;  %s24_s16 = int_to_ptr.hbm [resolvable:$true] %s23_s16 }
   0x4   :  { %s734_s17 = smov 64   ;;  %s735_s18 = smov 4  }
   0x5   :  { %46 = dma.hbm_to_vmem [thread:$0]  %s39_s11, 1024, %s41_s13, [#allocation5], %s734_s17, %s734_s17, %s735_s18  }
   0x6   :  { %s736_s19 = smov [#allocation2]   ;;  %s53_s23 = sshll.u32 %s824_s5, 4  ;;  %s54_s23 = int_to_ptr.hbm [resolvable:$true] %s53_s23 }
   0x7   :  { %s25_s20 = sshll.u32 %s736_s19, 4  ;;  %s68_s25 = sshll.u32 %s826_s7, 4  ;;  %s26_s20 = int_to_ptr.vmem [resolvable:$true] %s25_s20  ;;  %s69_s25 = int_to_ptr.hbm [resolvable:$true] %s68_s25 }
   0x8   :  { %31 = dma.hbm_to_vmem [thread:$0]  %s24_s16, 1024, %s26_s20, [#allocation3], %s734_s17, %s734_s17, %s735_s18  }
   0x9   :  { %s737_s26 = smov [#allocation6]   ;;  %s738_s1 = smov [#allocation7]  }
   0xa   :  { %s55_s27 = sshll.u32 %s737_s26, 4  ;;  %s70_s28 = sshll.u32 %s738_s1, 4  ;;  %s56_s27 = int_to_ptr.vmem [resolvable:$true] %s55_s27  ;;  %s71_s28 = int_to_ptr.vmem [resolvable:$true] %s70_s28 }
   0xb   :  { %61 = dma.hbm_to_vmem [thread:$0]  %s54_s23, 1024, %s56_s27, [#allocation5], %s734_s17, %s734_s17, %s735_s18  }
   0xc   :  { %76 = dma.hbm_to_vmem [thread:$0]  %s69_s25, 1024, %s71_s28, [#allocation8], %s734_s17, %s734_s17, %s735_s18  }
   0xd   :  { %727 = dma.done.wait [#allocation3], 1024  }
   0xe   :  { %728 = vsyncadd [#allocation3], 4294966272 }
   0xf   :  { %729 = dma.done.wait [#allocation5], 2048  }
  0x10   :  { %730 = vsyncadd [#allocation5], 4294965248 }
  0x11   :  { %731 = dma.done.wait [#allocation8], 1024  }
  0x12   :  { %732 = vsyncadd [#allocation8], 4294966272  ;;  %v591_v0 = vld [vmem:[#allocation2 + $0x38] sm:$0xff]  ;;  %v590_v1 = vld [vmem:[#allocation2 + $0x30] sm:$0xff] }
  0x13   :  { %171 = vmatpush.bf16.msra.mxu0 %v591_v0  ;;  %v599_v2 = vld [vmem:[#allocation4 + $0x38] sm:$0xff]  ;;  %v598_v3 = vld [vmem:[#allocation4 + $0x30] sm:$0xff]  ;;  %v589_v4 = vld [vmem:[#allocation2 + $0x28] sm:$0xff] }
  0x14   :  { %256 = vmatpush.bf16.msra.mxu1 %v599_v2  ;;  %v597_v5 = vld [vmem:[#allocation4 + $0x28] sm:$0xff]  ;;  %v588_v6 = vld [vmem:[#allocation2 + $0x20] sm:$0xff]  ;;  %v587_v8 = vld [vmem:[#allocation2 + $0x18] sm:$0xff] }
  0x15   :  { %v596_v7 = vld [vmem:[#allocation4 + $0x20] sm:$0xff]  ;;  %v586_v9 = vld [vmem:[#allocation2 + $0x10] sm:$0xff]  ;;  %v585_v10 = vld [vmem:[#allocation2 + $0x8] sm:$0xff] }
  0x16   :  { %v584_v11 = vld [vmem:[#allocation2] sm:$0xff]  ;;  %v595_v13 = vld [vmem:[#allocation4 + $0x18] sm:$0xff]  ;;  %v594_v14 = vld [vmem:[#allocation4 + $0x10] sm:$0xff] }
  0x17   :  { %172 = vmatpush.bf16.msra.mxu0 %v590_v1  ;;  %v583_v12 = vld [vmem:[%s819_s0] sm:$0xff]  ;;  %v593_v15 = vld [vmem:[#allocation4 + $0x8] sm:$0xff]  ;;  %v607_v17 = vld [vmem:[#allocation6 + $0x38] sm:$0xff] }
  0x18   :  { %257 = vmatpush.bf16.msra.mxu1 %v598_v3  ;;  %v592_v16 = vld [vmem:[#allocation4] sm:$0xff]  ;;  %341 = vmatpush.bf16.msra.mxu2 %v607_v17  ;;  %v606_v18 = vld [vmem:[#allocation6 + $0x30] sm:$0xff]  ;;  %v605_v19 = vld [vmem:[#allocation6 + $0x28] sm:$0xff] }
  0x19   :  { %v604_v20 = vld [vmem:[#allocation6 + $0x20] sm:$0xff]  ;;  %v603_v29 = vld [vmem:[#allocation6 + $0x18] sm:$0xff]  ;;  %v602_v30 = vld [vmem:[#allocation6 + $0x10] sm:$0xff] }
  0x1a   :  { %v627_v22 = vld [vmem:[%s821_s2] ss:$0 sm:$0xff]  ;;  %v601_v31 = vld [vmem:[#allocation6 + $0x8] sm:$0xff]  ;;  %v615_v33 = vld [vmem:[#allocation7 + $0x38] sm:$0xff] }
  0x1b   :  { %173 = vmatpush.bf16.msra.mxu0 %v589_v4  ;;  %v600_v32 = vld [vmem:[#allocation6] sm:$0xff]  ;;  %426 = vmatpush.bf16.msra.mxu3 %v615_v33  ;;  %v614_v34 = vld [vmem:[#allocation7 + $0x30] sm:$0xff]  ;;  %v613_v35 = vld [vmem:[#allocation7 + $0x28] sm:$0xff] }
  0x1c   :  { %258 = vmatpush.bf16.msra.mxu1 %v597_v5  ;;  %342 = vmatpush.bf16.msra.mxu2 %v606_v18  ;;  %v612_v36 = vld [vmem:[#allocation7 + $0x20] sm:$0xff]  ;;  %v611_v45 = vld [vmem:[#allocation7 + $0x18] sm:$0xff]  ;;  %v610_v46 = vld [vmem:[#allocation7 + $0x10] sm:$0xff] }
  0x1d   :  { %v628_v38 = vld [vmem:[%s823_s4] ss:$0 sm:$0xff]  ;;  %v609_v47 = vld [vmem:[#allocation7 + $0x8] sm:$0xff] }
  0x1e   :  { %v608_v48 = vld [vmem:[#allocation7] sm:$0xff] }
  0x1f   :  { %174 = vmatpush.bf16.msra.mxu0 %v588_v6  ;;  %427 = vmatpush.bf16.msra.mxu3 %v614_v34  ;;  %v629_v50 = vld [vmem:[%s825_s6] ss:$0 sm:$0xff] }
  0x20   :  { %259 = vmatpush.bf16.msra.mxu1 %v596_v7  ;;  %343 = vmatpush.bf16.msra.mxu2 %v605_v19  ;;  %v630_v58 = vld [vmem:[%s827_s8] ss:$0 sm:$0xff] }
  0x23   :  { %175 = vmatpush.bf16.msra.mxu0 %v587_v8  ;;  %428 = vmatpush.bf16.msra.mxu3 %v613_v35 }
  0x24   :  { %260 = vmatpush.bf16.msra.mxu1 %v595_v13  ;;  %344 = vmatpush.bf16.msra.mxu2 %v604_v20 }
  0x27   :  { %176 = vmatpush.bf16.msra.mxu0 %v586_v9  ;;  %429 = vmatpush.bf16.msra.mxu3 %v612_v36 }
  0x28   :  { %261 = vmatpush.bf16.msra.mxu1 %v594_v14  ;;  %345 = vmatpush.bf16.msra.mxu2 %v603_v29 }
  0x2b   :  { %177 = vmatpush.bf16.msra.mxu0 %v585_v10  ;;  %430 = vmatpush.bf16.msra.mxu3 %v611_v45 }
  0x2c   :  { %262 = vmatpush.bf16.msra.mxu1 %v593_v15  ;;  %346 = vmatpush.bf16.msra.mxu2 %v602_v30 }
  0x2f   :  { %178 = vmatpush.bf16.msra.mxu0 %v584_v11  ;;  %431 = vmatpush.bf16.msra.mxu3 %v610_v46 }
  0x30   :  { %263 = vmatpush.bf16.msra.mxu1 %v592_v16  ;;  %347 = vmatpush.bf16.msra.mxu2 %v601_v31 }
  0x32   :  { %179 = vmatmul.bf16.vlgmr.msra.gmra.mxu0 %v583_v12 }
  0x33   :  { %432 = vmatpush.bf16.msra.mxu3 %v609_v47 }
  0x34   :  { %348 = vmatpush.bf16.msra.mxu2 %v600_v32 }
  0x37   :  { %433 = vmatpush.bf16.msra.mxu3 %v608_v48 }
  0xaf   :  { %v180_v21 = vpop.f32.mrf.mxu0 }
  0xb0   :  { %v181_v23 = vadd.f32 %v627_v22, %v180_v21 }
  0xb2   :  { %v185_v26 = vmax.f32 %v181_v23, 0.0 }
  0xb7   :  { %v182_v24 = vpop.f32.mrf.mxu0 }
  0xb8   :  { %v183_v25 = vadd.f32 %v627_v22, %v182_v24 }
  0xba   :  { %v186_v27 = vmax.f32 %v183_v25, 0.0 }
  0xbc   :  { %v187_v28 = vpack.c.bf16 %v186_v27, %v185_v26 }
  0xbe   :  { %264 = vmatmul.bf16.vlgmr.msra.gmra.mxu1 %v187_v28 }
 0x13b   :  { %v265_v37 = vpop.f32.mrf.mxu1 }
 0x13c   :  { %v266_v39 = vadd.f32 %v628_v38, %v265_v37 }
 0x13e   :  { %v270_v42 = vmax.f32 %v266_v39, 0.0 }
 0x143   :  { %v267_v40 = vpop.f32.mrf.mxu1 }
 0x144   :  { %v268_v41 = vadd.f32 %v628_v38, %v267_v40 }
 0x146   :  { %v271_v43 = vmax.f32 %v268_v41, 0.0 }
 0x148   :  { %v272_v44 = vpack.c.bf16 %v271_v43, %v270_v42 }
 0x14a   :  { %349 = vmatmul.bf16.vlgmr.msra.gmra.mxu2 %v272_v44 }
 0x1cd   :  { %v350_v49 = vpop.f32.mrf.mxu2 }
 0x1ce   :  { %v351_v51 = vadd.f32 %v629_v50, %v350_v49 }
 0x1d0   :  { %v355_v54 = vmax.f32 %v351_v51, 0.0 }
 0x1d5   :  { %v352_v52 = vpop.f32.mrf.mxu2 }
 0x1d6   :  { %v353_v53 = vadd.f32 %v629_v50, %v352_v52 }
 0x1d8   :  { %v356_v55 = vmax.f32 %v353_v53, 0.0 }
 0x1da   :  { %v357_v56 = vpack.c.bf16 %v356_v55, %v355_v54 }
 0x1dc   :  { %434 = vmatmul.bf16.vlgmr.msra.gmra.mxu3 %v357_v56 }
 0x25f   :  { %v435_v57 = vpop.f32.mrf.mxu3 }
 0x260   :  { %v436_v60 = vadd.f32 %v630_v58, %v435_v57 }
 0x267   :  { %v437_v59 = vpop.f32.mrf.mxu3 }
 0x268   :  { %v438_v61 = vadd.f32 %v630_v58, %v437_v59 }
 0x26a   :  { %v619_v62 = vpack.c.bf16 %v438_v61, %v436_v60 }
 0x26c   :  { %620 = vst [vmem:[%s828_s9] sm:$0xff] %v619_v62  }
 0x26d   :  { %448 = vsyncpa [#allocation3], 1 }
 0x26e   :  { %449 = vsyncpa [#allocation5], 1 }
 0x26f   :  { %450 = vsyncpa [#allocation8], 1 }

</bundles_post_ra>
